<compile_context>
chip_gen: v7x
topology: tpu7x:2x2x1
jax: 0.10.0
libtpu: 0.0.40
codegen_flags: <defaults>
</compile_context>

<pallas_src>
import jax
import jax.numpy as jnp
from jax.experimental import pallas as pl
from jax.experimental.pallas import tpu as pltpu

NEG_SLOPE = 0.01   # F.leaky_relu default negative_slope
LANE = 128         # lane width for a dense output store
TB_MAX = 1024      # batch-tile cap (fits comfortably in VMEM on v5e/v6e/v7x)


def _round_up(x, m):
    return ((x + m - 1) // m) * m


def _leaky_relu(x):
    return jnp.where(x > 0, x, NEG_SLOPE * x)


def actor_kernel(x_ref, w1_ref, b1_ref, w2_ref, b2_ref, w3_ref, b3_ref, o_ref):
    # Three MXU matmuls (bf16 inputs, f32 accumulate) fused with VPU leaky-relu
    # and a stable softmax over the lane-dense (padded) action axis.
    x = x_ref[...].astype(jnp.bfloat16)

    h1 = jnp.dot(x, w1_ref[...], preferred_element_type=jnp.float32) + b1_ref[...]
    h1 = _leaky_relu(h1)

    h2 = jnp.dot(h1.astype(jnp.bfloat16), w2_ref[...],
                 preferred_element_type=jnp.float32) + b2_ref[...]
    h2 = _leaky_relu(h2)

    logits = jnp.dot(h2.astype(jnp.bfloat16), w3_ref[...],
                     preferred_element_type=jnp.float32) + b3_ref[...]

    # Numerically stable softmax; padded columns carry a -1e30 bias so their
    # exp() underflows to exactly 0 and the normalization matches the unpadded
    # softmax. Reciprocal goes to the EUP (approx vrcp) -- essentially free.
    m = jnp.max(logits, axis=-1, keepdims=True)
    e = jnp.exp(logits - m)
    denom = jnp.sum(e, axis=-1, keepdims=True)
    o_ref[...] = (e * pl.reciprocal(denom, approx=True)).astype(o_ref.dtype)


def actor_forward(state, params, *, tb_max=TB_MAX):
    """state: (batch, state_dim) f32 -> (batch, action_dim) softmax probs."""
    w1, b1 = params["w1"], params["b1"]
    w2, b2 = params["w2"], params["b2"]
    w3, b3 = params["w3"], params["b3"]        # already padded to LANE columns
    action_dim = params["action_dim"]

    batch, state_dim = state.shape
    hidden = w1.shape[1]
    padded_adim = w3.shape[1]

    # Batch tiling: multiple of 8 sublanes; pad batch up to a whole tile so every
    # grid step sees a full, well-defined block (pad rows are benign: softmax of
    # finite logits, sliced off below).
    tb = min(tb_max, _round_up(batch, 8))
    padded_batch = _round_up(batch, tb)
    if padded_batch != batch:
        state = jnp.pad(state, ((0, padded_batch - batch), (0, 0)))

    grid = (padded_batch // tb,)

    flops = 2 * padded_batch * (state_dim * hidden + hidden * hidden + hidden * padded_adim)
    bytes_accessed = (
        padded_batch * state_dim * 4                     # state in (f32)
        + (w1.size + w2.size + w3.size) * 2              # bf16 weights
        + (b1.size + b2.size + b3.size) * 4              # f32 biases
        + padded_batch * padded_adim * 4                 # output (f32)
    )
    transcendentals = padded_batch * padded_adim         # exp per output element

    out = pl.pallas_call(
        actor_kernel,
        out_shape=jax.ShapeDtypeStruct((padded_batch, padded_adim), jnp.float32),
        grid=grid,
        in_specs=[
            pl.BlockSpec((tb, state_dim), lambda i: (i, 0)),          # state tile
            pl.BlockSpec((state_dim, hidden), lambda i: (0, 0)),      # W1 (resident)
            pl.BlockSpec((1, hidden), lambda i: (0, 0)),              # b1
            pl.BlockSpec((hidden, hidden), lambda i: (0, 0)),         # W2 (resident)
            pl.BlockSpec((1, hidden), lambda i: (0, 0)),              # b2
            pl.BlockSpec((hidden, padded_adim), lambda i: (0, 0)),    # W3 (resident)
            pl.BlockSpec((1, padded_adim), lambda i: (0, 0)),         # b3
        ],
        out_specs=pl.BlockSpec((tb, padded_adim), lambda i: (i, 0)),
        compiler_params=pltpu.CompilerParams(
            dimension_semantics=("parallel",),            # shard batch across TCs (v7x)
        ),
        cost_estimate=pl.CostEstimate(
            flops=flops,
            transcendentals=transcendentals,
            bytes_accessed=bytes_accessed,
        ),
    )(state, w1, b1, w2, b2, w3, b3)

    return out[:batch, :action_dim]


def init_actor_params(key, state_dim, action_dim, hidden=256):
    """Mimics nn.Linear default init (uniform +-1/sqrt(fan_in)); weights stored
    as (in, out) bf16, biases f32. Layer-3 padded to a lane-dense width."""
    padded_adim = max(LANE, _round_up(action_dim, LANE))
    ks = jax.random.split(key, 6)

    def linear(kw, kb, fan_in, fan_out):
        bound = float(fan_in) ** -0.5
        w = jax.random.uniform(kw, (fan_in, fan_out), jnp.float32, -bound, bound)
        b = jax.random.uniform(kb, (1, fan_out), jnp.float32, -bound, bound)
        return w, b

    w1, b1 = linear(ks[0], ks[1], state_dim, hidden)
    w2, b2 = linear(ks[2], ks[3], hidden, hidden)
    w3, b3 = linear(ks[4], ks[5], hidden, action_dim)

    # Pad layer 3: zero weights + very negative bias => padded logits get exactly
    # zero probability mass, so softmax over the padded slab equals the true one.
    w3p = jnp.zeros((hidden, padded_adim), jnp.float32).at[:, :action_dim].set(w3)
    b3p = jnp.full((1, padded_adim), -1e30, jnp.float32).at[:, :action_dim].set(b3)

    # TODO(synk): fp8 (e4m3) storage for W2 on v7x would quarter the dominant
    # weight DMA; kept bf16 here for cross-generation portability.
    return {
        "w1": w1.astype(jnp.bfloat16), "b1": b1,
        "w2": w2.astype(jnp.bfloat16), "b2": b2,
        "w3": w3p.astype(jnp.bfloat16), "b3": b3p,
        "action_dim": action_dim,
    }


def actor_reference_bf16(state, params):
    """Mirrors the kernel's numerics (bf16 MXU inputs, f32 accumulate, exact div)."""
    h1 = jnp.dot(state.astype(jnp.bfloat16), params["w1"],
                 preferred_element_type=jnp.float32) + params["b1"]
    h1 = _leaky_relu(h1)
    h2 = jnp.dot(h1.astype(jnp.bfloat16), params["w2"],
                 preferred_element_type=jnp.float32) + params["b2"]
    h2 = _leaky_relu(h2)
    logits = jnp.dot(h2.astype(jnp.bfloat16), params["w3"],
                     preferred_element_type=jnp.float32) + params["b3"]
    return jax.nn.softmax(logits, axis=-1)[:, :params["action_dim"]]


def actor_reference_f32(state, params):
    """Pure-f32 PyTorch-semantics reference (sanity check only)."""
    w1 = params["w1"].astype(jnp.float32)
    w2 = params["w2"].astype(jnp.float32)
    w3 = params["w3"].astype(jnp.float32)
    a = jax.nn.leaky_relu(state @ w1 + params["b1"], NEG_SLOPE)
    a = jax.nn.leaky_relu(a @ w2 + params["b2"], NEG_SLOPE)
    return jax.nn.softmax(a @ w3 + params["b3"], axis=-1)[:, :params["action_dim"]]


if __name__ == "__main__":
    key = jax.random.PRNGKey(0)
    k_param, k_state = jax.random.split(key)

    batch, state_dim, action_dim = 2, 32, 8
    params = init_actor_params(k_param, state_dim, action_dim)
    state = jax.random.normal(k_state, (batch, state_dim), jnp.float32)

    out = jax.block_until_ready(actor_forward(state, params))
    assert out.shape == (batch, action_dim)

    ref = actor_reference_bf16(state, params)
    assert jnp.allclose(out, ref, atol=5e-3, rtol=5e-3), "mismatch vs bf16 reference"

    ref32 = actor_reference_f32(state, params)
    assert jnp.allclose(out, ref32, atol=5e-2, rtol=5e-2), "mismatch vs f32 reference"

    assert jnp.allclose(jnp.sum(out, axis=-1), 1.0, atol=5e-3), "softmax not normalized"

    print("KERNEL_OK")
</pallas_src>

<mosaic_0001>
module attributes {stable_mosaic.version = 11 : i64} {
  func.func @actor_kernel(%arg0: i32, %arg1: memref<8x32xf32, #tpu.memory_space<vmem>>, %arg2: memref<32x256xbf16, #tpu.memory_space<vmem>>, %arg3: memref<1x256xf32, #tpu.memory_space<vmem>>, %arg4: memref<256x256xbf16, #tpu.memory_space<vmem>>, %arg5: memref<1x256xf32, #tpu.memory_space<vmem>>, %arg6: memref<256x128xbf16, #tpu.memory_space<vmem>>, %arg7: memref<1x128xf32, #tpu.memory_space<vmem>>, %arg8: memref<8x128xf32, #tpu.memory_space<vmem>>) attributes {dimension_semantics = [#tpu.dimension_semantics<parallel>], iteration_bounds = array<i64: 1>, scalar_prefetch = 0 : i64, scratch_operands = 0 : i64, tpu.core_type = #tpu.core_type<tc>, window_params = [{transform_indices = @transform_0, window_bounds = array<i64: 8, 32>}, {pipeline_mode = #tpu.pipeline_mode<synchronous>, transform_indices = @transform_1, window_bounds = array<i64: 32, 256>}, {pipeline_mode = #tpu.pipeline_mode<synchronous>, transform_indices = @transform_2, window_bounds = array<i64: 1, 256>}, {pipeline_mode = #tpu.pipeline_mode<synchronous>, transform_indices = @transform_3, window_bounds = array<i64: 256, 256>}, {pipeline_mode = #tpu.pipeline_mode<synchronous>, transform_indices = @transform_4, window_bounds = array<i64: 1, 256>}, {pipeline_mode = #tpu.pipeline_mode<synchronous>, transform_indices = @transform_5, window_bounds = array<i64: 256, 128>}, {pipeline_mode = #tpu.pipeline_mode<synchronous>, transform_indices = @transform_6, window_bounds = array<i64: 1, 128>}, {transform_indices = @transform_7, window_bounds = array<i64: 8, 128>}]} {
    %c0 = arith.constant 0 : index
    %c0_0 = arith.constant 0 : index
    %0 = vector.load %arg1[%c0, %c0_0] : memref<8x32xf32, #tpu.memory_space<vmem>>, vector<8x32xf32>
    %1 = arith.truncf %0 : vector<8x32xf32> to vector<8x32xbf16>
    %c0_1 = arith.constant 0 : index
    %c0_2 = arith.constant 0 : index
    %2 = vector.load %arg2[%c0_1, %c0_2] : memref<32x256xbf16, #tpu.memory_space<vmem>>, vector<32x256xbf16>
    %cst = arith.constant dense<0.000000e+00> : vector<8x256xf32>
    %3 = tpu.matmul %1, %2, %cst {dimension_numbers = #tpu.dot_dimension_numbers<[1], [0], [0], [1], [0, 0, 1, 1], [], []>} : vector<8x32xbf16>, vector<32x256xbf16>, vector<8x256xf32> -> vector<8x256xf32>
    %c0_3 = arith.constant 0 : index
    %c0_4 = arith.constant 0 : index
    %4 = vector.load %arg3[%c0_3, %c0_4] : memref<1x256xf32, #tpu.memory_space<vmem>>, vector<1x256xf32>
    %5 = vector.broadcast %4 : vector<1x256xf32> to vector<8x256xf32>
    %6 = arith.addf %3, %5 : vector<8x256xf32>
    %cst_5 = arith.constant 0.000000e+00 : f32
    %7 = vector.broadcast %cst_5 : f32 to vector<8x256xf32>
    %8 = arith.cmpf ogt, %6, %7 : vector<8x256xf32>
    %cst_6 = arith.constant 0.00999999977 : f32
    %9 = vector.broadcast %cst_6 : f32 to vector<8x256xf32>
    %10 = arith.mulf %9, %6 : vector<8x256xf32>
    %11 = arith.select %8, %6, %10 : vector<8x256xi1>, vector<8x256xf32>
    %12 = arith.truncf %11 : vector<8x256xf32> to vector<8x256xbf16>
    %c0_7 = arith.constant 0 : index
    %c0_8 = arith.constant 0 : index
    %13 = vector.load %arg4[%c0_7, %c0_8] : memref<256x256xbf16, #tpu.memory_space<vmem>>, vector<256x256xbf16>
    %cst_9 = arith.constant dense<0.000000e+00> : vector<8x256xf32>
    %14 = tpu.matmul %12, %13, %cst_9 {dimension_numbers = #tpu.dot_dimension_numbers<[1], [0], [0], [1], [0, 0, 1, 1], [], []>} : vector<8x256xbf16>, vector<256x256xbf16>, vector<8x256xf32> -> vector<8x256xf32>
    %c0_10 = arith.constant 0 : index
    %c0_11 = arith.constant 0 : index
    %15 = vector.load %arg5[%c0_10, %c0_11] : memref<1x256xf32, #tpu.memory_space<vmem>>, vector<1x256xf32>
    %16 = vector.broadcast %15 : vector<1x256xf32> to vector<8x256xf32>
    %17 = arith.addf %14, %16 : vector<8x256xf32>
    %cst_12 = arith.constant 0.000000e+00 : f32
    %18 = vector.broadcast %cst_12 : f32 to vector<8x256xf32>
    %19 = arith.cmpf ogt, %17, %18 : vector<8x256xf32>
    %cst_13 = arith.constant 0.00999999977 : f32
    %20 = vector.broadcast %cst_13 : f32 to vector<8x256xf32>
    %21 = arith.mulf %20, %17 : vector<8x256xf32>
    %22 = arith.select %19, %17, %21 : vector<8x256xi1>, vector<8x256xf32>
    %23 = arith.truncf %22 : vector<8x256xf32> to vector<8x256xbf16>
    %c0_14 = arith.constant 0 : index
    %c0_15 = arith.constant 0 : index
    %24 = vector.load %arg6[%c0_14, %c0_15] : memref<256x128xbf16, #tpu.memory_space<vmem>>, vector<256x128xbf16>
    %cst_16 = arith.constant dense<0.000000e+00> : vector<8x128xf32>
    %25 = tpu.matmul %23, %24, %cst_16 {dimension_numbers = #tpu.dot_dimension_numbers<[1], [0], [0], [1], [0, 0, 1, 1], [], []>} : vector<8x256xbf16>, vector<256x128xbf16>, vector<8x128xf32> -> vector<8x128xf32>
    %c0_17 = arith.constant 0 : index
    %c0_18 = arith.constant 0 : index
    %26 = vector.load %arg7[%c0_17, %c0_18] : memref<1x128xf32, #tpu.memory_space<vmem>>, vector<1x128xf32>
    %27 = vector.broadcast %26 : vector<1x128xf32> to vector<8x128xf32>
    %28 = arith.addf %25, %27 : vector<8x128xf32>
    %cst_19 = arith.constant dense<0xFF800000> : vector<8xf32>
    %29 = vector.multi_reduction <maximumf>, %28, %cst_19 [1] : vector<8x128xf32> to vector<8xf32>
    %30 = vector.shape_cast %29 : vector<8xf32> to vector<8x1xf32>
    %31 = vector.broadcast %30 : vector<8x1xf32> to vector<8x128xf32>
    %32 = arith.subf %28, %31 : vector<8x128xf32>
    %33 = math.exp %32 : vector<8x128xf32>
    %cst_20 = arith.constant dense<0.000000e+00> : vector<8xf32>
    %34 = vector.multi_reduction <add>, %33, %cst_20 [1] : vector<8x128xf32> to vector<8xf32>
    %35 = vector.shape_cast %34 : vector<8xf32> to vector<8x1xf32>
    %36 = tpu.reciprocal %35 {approx = true} : vector<8x1xf32> -> vector<8x1xf32>
    %37 = vector.broadcast %36 : vector<8x1xf32> to vector<8x128xf32>
    %38 = arith.mulf %33, %37 : vector<8x128xf32>
    %c0_21 = arith.constant 0 : index
    %c0_22 = arith.constant 0 : index
    %39 = vector.load %arg8[%c0_21, %c0_22] : memref<8x128xf32, #tpu.memory_space<vmem>>, vector<8x128xf32>
    tpu.vector_store %arg8[%c0_21, %c0_22], %38 {strides = array<i32>} : memref<8x128xf32, #tpu.memory_space<vmem>>, vector<8x128xf32>,
    return
  }
  func.func @transform_0(%arg0: i32) -> (i32, i32) {
    %c0_i32 = arith.constant 0 : i32
    %c0_i32_0 = arith.constant 0 : i32
    return %arg0, %c0_i32 : i32, i32
  }
  func.func @transform_1(%arg0: i32) -> (i32, i32) {
    %c0_i32 = arith.constant 0 : i32
    %c0_i32_0 = arith.constant 0 : i32
    %c0_i32_1 = arith.constant 0 : i32
    return %c0_i32, %c0_i32_0 : i32, i32
  }
  func.func @transform_2(%arg0: i32) -> (i32, i32) {
    %c0_i32 = arith.constant 0 : i32
    %c0_i32_0 = arith.constant 0 : i32
    %c0_i32_1 = arith.constant 0 : i32
    return %c0_i32, %c0_i32_0 : i32, i32
  }
  func.func @transform_3(%arg0: i32) -> (i32, i32) {
    %c0_i32 = arith.constant 0 : i32
    %c0_i32_0 = arith.constant 0 : i32
    %c0_i32_1 = arith.constant 0 : i32
    return %c0_i32, %c0_i32_0 : i32, i32
  }
  func.func @transform_4(%arg0: i32) -> (i32, i32) {
    %c0_i32 = arith.constant 0 : i32
    %c0_i32_0 = arith.constant 0 : i32
    %c0_i32_1 = arith.constant 0 : i32
    return %c0_i32, %c0_i32_0 : i32, i32
  }
  func.func @transform_5(%arg0: i32) -> (i32, i32) {
    %c0_i32 = arith.constant 0 : i32
    %c0_i32_0 = arith.constant 0 : i32
    %c0_i32_1 = arith.constant 0 : i32
    return %c0_i32, %c0_i32_0 : i32, i32
  }
  func.func @transform_6(%arg0: i32) -> (i32, i32) {
    %c0_i32 = arith.constant 0 : i32
    %c0_i32_0 = arith.constant 0 : i32
    %c0_i32_1 = arith.constant 0 : i32
    return %c0_i32, %c0_i32_0 : i32, i32
  }
  func.func @transform_7(%arg0: i32) -> (i32, i32) {
    %c0_i32 = arith.constant 0 : i32
    %c0_i32_0 = arith.constant 0 : i32
    return %arg0, %c0_i32 : i32, i32
  }
}

</mosaic_0001>

<bundles_post_ra>
// kernel: tpu_custom_call.1
= control target key start
LH: loop header
LB: loop body
LE: loop exit
PB: predicated region body
PF: predicated region fallthrough
CT: control target
= control target key end

     0   :  { %12 = vsyncpa [#allocation3], 0  ;;  %s1030_s0 = inlined_call_operand.hbm [shape: f32[8,32], index: 0, kind: input, shape index: {}]   ;;  %s1031_s1 = inlined_call_operand.hbm [shape: bf16[32,256], index: 1, kind: input, shape index: {}]   ;;  %s1032_s2 = inlined_call_operand.vmem [shape: f32[1,256], index: 2, kind: input, shape index: {}]   ;;  %s1033_s3 = inlined_call_operand.hbm [shape: bf16[256,256], index: 3, kind: input, shape index: {}]   ;;  %s1034_s4 = inlined_call_operand.vmem [shape: f32[1,256], index: 4, kind: input, shape index: {}]   ;;  %s1035_s5 = inlined_call_operand.hbm [shape: bf16[256,128], index: 5, kind: input, shape index: {}]   ;;  %s1036_s6 = inlined_call_operand.vmem [shape: f32[1,128], index: 6, kind: input, shape index: {}]   ;;  %s1037_s7 = inlined_call_operand.hbm [shape: f32[8,128], index: 7, kind: output, shape index: {}]  }
   0x1   :  { %13 = vsyncpa [#allocation6], 0 }
   0x2   :  { %14 = vsyncpa [#allocation9], 0 }
   0x3   :  { %15 = vsyncpa [#allocation4], 0  ;;  %s905_s24 = smov [#allocation5]   ;;  %s787_s28 = scalar_lea.hbm %s1031_s1, 512 }
   0x4   :  { %s31_s25 = sshll.u32 %s905_s24, 4  ;;  %p788_p0 = scmp.ne.s32.totalorder %s1031_s1, %s787_s28  ;;  %s32_s25 = int_to_ptr.vmem [resolvable:$true] %s31_s25 }
   0x5   :  { %p791_p1 = scmp.lt.u32.totalorder %s787_s28, %s1031_s1 }
   0x7   :  { %p793_p2 = pnand %p791_p1, %p788_p0 }
   0x9   :  { %796 = shalt.err (!%p793_p2)
}
   0xa   :  { %s797_s10 = scalar_lea.vmem %s32_s25, 512  ;;  %p802_p4 = scmp.lt.s32.totalorder %s32_s25, %s32_s25 }
   0xb   :  { %p798_p3 = scmp.ne.s32.totalorder %s32_s25, %s797_s10  ;;  %p803_p5 = scmp.lt.s32.totalorder %s797_s10, %s797_s10 }
   0xd   :  { %p804_p6 = por %p803_p5, %p802_p4 }
   0xf   :  { %p805_p7 = pnand %p804_p6, %p798_p3 }
  0x11   :  { %808 = shalt.err (!%p805_p7)
}
  0x12   :  { %s906_s11 = smov 128   ;;  %s907_s12 = smov 8  }
  0x13   :  { %37 = dma.hbm_to_vmem [thread:$0]  %s1031_s1, 512, %s32_s25, [#allocation6], %s906_s11, %s906_s11, %s907_s12  }
  0x14   :  { %s908_s15 = smov [#allocation2]   ;;  %s909_s17 = smov [#allocation7]  }
  0x15   :  { %s22_s16 = sshll.u32 %s908_s15, 4  ;;  %s45_s18 = sshll.u32 %s909_s17, 4  ;;  %s23_s16 = int_to_ptr.vmem [resolvable:$true] %s22_s16  ;;  %s46_s18 = int_to_ptr.vmem [resolvable:$true] %s45_s18 }
  0x16   :  { %s809_s21 = scalar_lea.hbm %s1030_s0, 128 }
  0x17   :  { %p810_p8 = scmp.ne.s32.totalorder %s1030_s0, %s809_s21  ;;  %p813_p9 = scmp.lt.u32.totalorder %s809_s21, %s1030_s0 }
  0x19   :  { %p815_p10 = pnand %p813_p9, %p810_p8 }
  0x1b   :  { %818 = shalt.err (!%p815_p10)
}
  0x1c   :  { %s819_s1 = scalar_lea.vmem %s23_s16, 128  ;;  %p824_p12 = scmp.lt.s32.totalorder %s23_s16, %s23_s16 }
  0x1d   :  { %p820_p11 = scmp.ne.s32.totalorder %s23_s16, %s819_s1  ;;  %p825_p13 = scmp.lt.s32.totalorder %s819_s1, %s819_s1 }
  0x1f   :  { %p826_p0 = por %p825_p13, %p824_p12 }
  0x21   :  { %p827_p1 = pnand %p826_p0, %p820_p11 }
  0x23   :  { %830 = shalt.err (!%p827_p1)
}
  0x24   :  { %25 = dma.hbm_to_vmem [thread:$0]  %s1030_s0, 128, %s23_s16, [#allocation3]  }
  0x25   :  { %s831_s30 = scalar_lea.hbm %s1033_s3, 4096 }
  0x26   :  { %p832_p2 = scmp.ne.s32.totalorder %s1033_s3, %s831_s30  ;;  %p835_p3 = scmp.lt.u32.totalorder %s831_s30, %s1033_s3 }
  0x28   :  { %p837_p4 = pnand %p835_p3, %p832_p2 }
  0x2a   :  { %840 = shalt.err (!%p837_p4)
}
  0x2b   :  { %s841_s14 = scalar_lea.vmem %s46_s18, 4096  ;;  %p846_p6 = scmp.lt.s32.totalorder %s46_s18, %s46_s18 }
  0x2c   :  { %p842_p5 = scmp.ne.s32.totalorder %s46_s18, %s841_s14  ;;  %p847_p7 = scmp.lt.s32.totalorder %s841_s14, %s841_s14 }
  0x2e   :  { %p848_p8 = por %p847_p7, %p846_p6 }
  0x30   :  { %p849_p9 = pnand %p848_p8, %p842_p5 }
  0x32   :  { %852 = shalt.err (!%p849_p9)
}
  0x33   :  { %51 = dma.hbm_to_vmem [thread:$0]  %s1033_s3, 4096, %s46_s18, [#allocation6], %s906_s11, %s906_s11, %s907_s12  }
  0x34   :  { %s910_s16 = smov [#allocation8]   ;;  %s853_s21 = scalar_lea.hbm %s1035_s5, 2048 }
  0x35   :  { %s59_s17 = sshll.u32 %s910_s16, 4  ;;  %p854_p10 = scmp.ne.s32.totalorder %s1035_s5, %s853_s21  ;;  %s60_s17 = int_to_ptr.vmem [resolvable:$true] %s59_s17 }
  0x36   :  { %p857_p11 = scmp.lt.u32.totalorder %s853_s21, %s1035_s5 }
  0x38   :  { %p859_p12 = pnand %p857_p11, %p854_p10 }
  0x3a   :  { %862 = shalt.err (!%p859_p12)
}
  0x3b   :  { %s863_s1 = scalar_lea.vmem %s60_s17, 2048  ;;  %p868_p0 = scmp.lt.s32.totalorder %s60_s17, %s60_s17 }
  0x3c   :  { %p864_p13 = scmp.ne.s32.totalorder %s60_s17, %s863_s1  ;;  %p869_p1 = scmp.lt.s32.totalorder %s863_s1, %s863_s1 }
  0x3e   :  { %p870_p2 = por %p869_p1, %p868_p0 }
  0x40   :  { %p871_p3 = pnand %p870_p2, %p864_p13 }
  0x42   :  { %874 = shalt.err (!%p871_p3)
}
  0x43   :  { %s911_s3 = smov 64   ;;  %s912_s11 = smov 4  }
  0x44   :  { %65 = dma.hbm_to_vmem [thread:$0]  %s1035_s5, 2048, %s60_s17, [#allocation9], %s911_s3, %s911_s3, %s912_s11  }
  0x45   :  { %897 = dma.done.wait [#allocation3], 128  }
  0x46   :  { %898 = vsyncadd [#allocation3], 4294967168 }
  0x47   :  { %899 = dma.done.wait [#allocation6], 4608  }
  0x48   :  { %900 = vsyncadd [#allocation6], 4294962688 }
  0x49   :  { %901 = dma.done.wait [#allocation9], 2048  }
  0x4a   :  { %902 = vsyncadd [#allocation9], 4294965248  ;;  %v913_v0 = vmov 0   ;;  %v713_v1 = vld [vmem:[#allocation5 + $0x4] ss:$8 sps:$4 sm:$0xff]   ;;  %v81_v5 = vld [vmem:[#allocation2] sm:$0xff]  ;;  %v89_v51 = vlaneseq }
  0x4b   :  { %155 = vmatprep.mubr.bf16.mxu0 %v913_v0  ;;  %v715_v2 = vld [vmem:[#allocation5] ss:$8 sps:$4 sm:$0xff]   ;;  %123 = vmatprep.subr.bf16.mxu0 %v713_v1  ;;  %v716_v3 = vld [vmem:[#allocation5 + $0x14] ss:$8 sps:$4 sm:$0xff]   ;;  %v718_v4 = vld [vmem:[#allocation5 + $0x10] ss:$8 sps:$4 sm:$0xff]   ;;  %v82_v9 = vpack.c.bf16 %v81_v5, %v81_v5 }
  0x4c   :  { %124 = vmatpush1.bf16.msra.mxu0 %v715_v2  ;;  %v719_v6 = vld [vmem:[#allocation7 + $0x4] ss:$8 sps:$4 sm:$0xff]   ;;  %v721_v7 = vld [vmem:[#allocation7] ss:$8 sps:$4 sm:$0xff]   ;;  %v722_v8 = vld [vmem:[#allocation7 + $0x14] ss:$8 sps:$4 sm:$0xff]  }
  0x4d   :  { %125 = vmatprep.subr.bf16.mxu0 %v716_v3  ;;  %376 = vmatprep.subr.bf16.mxu1 %v719_v6  ;;  %v724_v10 = vld [vmem:[#allocation7 + $0x10] ss:$8 sps:$4 sm:$0xff]   ;;  %vm119_vm0 = vcmask 261120   ;;  %v725_v11 = vld [vmem:[#allocation7 + $0x24] ss:$8 sps:$4 sm:$0xff]   ;;  %v90_v52 = vshrl.u32 %v89_v51, 7 }
  0x4e   :  { %377 = vmatpush1.bf16.msra.mxu1 %v721_v7  ;;  %v727_v12 = vld [vmem:[#allocation7 + $0x20] ss:$8 sps:$4 sm:$0xff]   ;;  %v728_v13 = vld [vmem:[#allocation7 + $0x34] ss:$8 sps:$4 sm:$0xff]   ;;  %v730_v14 = vld [vmem:[#allocation7 + $0x30] ss:$8 sps:$4 sm:$0xff]  }
  0x4f   :  { %378 = vmatprep.subr.bf16.mxu1 %v722_v8  ;;  %v731_v15 = vld [vmem:[#allocation7 + $0x44] ss:$8 sps:$4 sm:$0xff]   ;;  %v733_v16 = vld [vmem:[#allocation7 + $0x40] ss:$8 sps:$4 sm:$0xff]   ;;  %v734_v17 = vld [vmem:[#allocation7 + $0x54] ss:$8 sps:$4 sm:$0xff]  }
  0x50   :  { %126 = vmatpush1.bf16.msra.mxu0 %v718_v4  ;;  %v736_v18 = vld [vmem:[#allocation7 + $0x50] ss:$8 sps:$4 sm:$0xff]   ;;  %v737_v19 = vld [vmem:[#allocation7 + $0x64] ss:$8 sps:$4 sm:$0xff]   ;;  %v739_v20 = vld [vmem:[#allocation7 + $0x60] ss:$8 sps:$4 sm:$0xff]  }
  0x51   :  { %v740_v21 = vld [vmem:[#allocation7 + $0x74] ss:$8 sps:$4 sm:$0xff]   ;;  %v742_v22 = vld [vmem:[#allocation7 + $0x70] ss:$8 sps:$4 sm:$0xff]   ;;  %v743_v23 = vld [vmem:[#allocation7 + $0x84] ss:$8 sps:$4 sm:$0xff]  }
  0x52   :  { %379 = vmatpush1.bf16.msra.mxu1 %v724_v10  ;;  %v745_v24 = vld [vmem:[#allocation7 + $0x80] ss:$8 sps:$4 sm:$0xff]   ;;  %v746_v25 = vld [vmem:[#allocation7 + $0x94] ss:$8 sps:$4 sm:$0xff]   ;;  %v748_v26 = vld [vmem:[#allocation7 + $0x90] ss:$8 sps:$4 sm:$0xff]  }
  0x53   :  { %631 = vmatmul.mubr.msk.bf16.vlgmr.msra.gmra.mrb[0].mxu0 %vm119_vm0, %v82_v9  ;;  %380 = vmatprep.subr.bf16.mxu1 %v725_v11  ;;  %v749_v27 = vld [vmem:[#allocation7 + $0xa4] ss:$8 sps:$4 sm:$0xff]   ;;  %v751_v28 = vld [vmem:[#allocation7 + $0xa0] ss:$8 sps:$4 sm:$0xff]   ;;  %v752_v29 = vld [vmem:[#allocation7 + $0xb4] ss:$8 sps:$4 sm:$0xff]  }
  0x54   :  { %v754_v30 = vld [vmem:[#allocation7 + $0xb0] ss:$8 sps:$4 sm:$0xff]   ;;  %v755_v31 = vld [vmem:[#allocation7 + $0xc4] ss:$8 sps:$4 sm:$0xff]   ;;  %v757_v32 = vld [vmem:[#allocation7 + $0xc0] ss:$8 sps:$4 sm:$0xff]  }
  0x55   :  { %v758_v33 = vld [vmem:[#allocation7 + $0xd4] ss:$8 sps:$4 sm:$0xff]   ;;  %v760_v34 = vld [vmem:[#allocation7 + $0xd0] ss:$8 sps:$4 sm:$0xff]   ;;  %v761_v35 = vld [vmem:[#allocation7 + $0xe4] ss:$8 sps:$4 sm:$0xff]  }
  0x56   :  { %381 = vmatpush1.bf16.msra.mxu1 %v727_v12  ;;  %v763_v36 = vld [vmem:[#allocation7 + $0xe0] ss:$8 sps:$4 sm:$0xff]   ;;  %v764_v37 = vld [vmem:[#allocation7 + $0xf4] ss:$8 sps:$4 sm:$0xff]   ;;  %v766_v38 = vld [vmem:[#allocation7 + $0xf0] ss:$8 sps:$4 sm:$0xff]  }
  0x57   :  { %382 = vmatprep.subr.bf16.mxu1 %v728_v13  ;;  %v767_v39 = vld [vmem:[#allocation8 + $0x40] sm:$0xff]   ;;  %v769_v41 = vld [vmem:[#allocation8 + $0x48] sm:$0xff]   ;;  %v771_v43 = vld [vmem:[#allocation8 + $0x50] sm:$0xff]   ;;  %v91_v53 = vsub.s32 0, %v90_v52  ;;  %v95_v55 = vsub.s32 1, %v90_v52  ;;  %s914_s29 = smov [#allocation10]  }
  0x58   :  { %v768_v40 = vld [vmem:[#allocation8] sm:$0xff]   ;;  %681 = vmatprep.subr.bf16.mxu0 %v767_v39  ;;  %v770_v42 = vld [vmem:[#allocation8 + $0x8] sm:$0xff]   ;;  %v772_v44 = vld [vmem:[#allocation8 + $0x10] sm:$0xff]   ;;  %s616_s30 = sshll.u32 %s914_s29, 4  ;;  %s617_s30 = int_to_ptr.vmem [resolvable:$true] %s616_s30 }
  0x59   :  { %682 = vmatpush3.bf16.msra.mxu0 %v768_v40  ;;  %v773_v45 = vld [vmem:[#allocation8 + $0x58] sm:$0xff]   ;;  %v775_v47 = vld [vmem:[#allocation8 + $0x60] sm:$0xff]   ;;  %v777_v49 = vld [vmem:[#allocation8 + $0x68] sm:$0xff]   ;;  %p880_p5 = scmp.lt.s32.totalorder %s617_s30, %s617_s30 }
  0x5a   :  { %383 = vmatpush1.bf16.msra.mxu1 %v730_v14  ;;  %683 = vmatprep.subr.bf16.mxu0 %v769_v41  ;;  %v774_v46 = vld [vmem:[#allocation8 + $0x18] sm:$0xff]   ;;  %v776_v48 = vld [vmem:[#allocation8 + $0x20] sm:$0xff]   ;;  %v778_v50 = vld [vmem:[#allocation8 + $0x28] sm:$0xff]  }
  0x5b   :  { %384 = vmatprep.subr.bf16.mxu1 %v731_v15  ;;  %v87_v54 = vld [vmem:[%s1032_s2] sm:$0x3]  ;;  %v779_v6 = vld [vmem:[#allocation8 + $0x70] sm:$0xff]  }
  0x5c   :  { %v92_v56 = vrot.slane %v87_v54, %v91_v53  ;;  %v96_v57 = vrot.slane %v87_v54, %v95_v55  ;;  %v780_v7 = vld [vmem:[#allocation8 + $0x30] sm:$0xff]   ;;  %v781_v8 = vld [vmem:[#allocation8 + $0x78] sm:$0xff]  }
  0x5d   :  { %684 = vmatpush3.bf16.msra.mxu0 %v770_v42  ;;  %v782_v9 = vld [vmem:[#allocation8 + $0x38] sm:$0xff]  }
  0x5e   :  { %385 = vmatpush1.bf16.msra.mxu1 %v733_v16  ;;  %685 = vmatprep.subr.bf16.mxu0 %v771_v43  ;;  %v204_v10 = vld [vmem:[%s1034_s4] sm:$0x3] }
  0x5f   :  { %386 = vmatprep.subr.bf16.mxu1 %v734_v17  ;;  %v209_v11 = vrot.slane %v204_v10, %v91_v53  ;;  %v213_v12 = vrot.slane %v204_v10, %v95_v55 }
  0x61   :  { %686 = vmatpush3.bf16.msra.mxu0 %v772_v44 }
  0x62   :  { %387 = vmatpush1.bf16.msra.mxu1 %v736_v18  ;;  %687 = vmatprep.subr.bf16.mxu0 %v773_v45 }
  0x63   :  { %388 = vmatprep.subr.bf16.mxu1 %v737_v19 }
  0x65   :  { %688 = vmatpush3.bf16.msra.mxu0 %v774_v46 }
  0x66   :  { %389 = vmatpush1.bf16.msra.mxu1 %v739_v20  ;;  %689 = vmatprep.subr.bf16.mxu0 %v775_v47 }
  0x67   :  { %390 = vmatprep.subr.bf16.mxu1 %v740_v21 }
  0x69   :  { %690 = vmatpush3.bf16.msra.mxu0 %v776_v48 }
  0x6a   :  { %391 = vmatpush1.bf16.msra.mxu1 %v742_v22  ;;  %691 = vmatprep.subr.bf16.mxu0 %v777_v49 }
  0x6b   :  { %392 = vmatprep.subr.bf16.mxu1 %v743_v23 }
  0x6d   :  { %692 = vmatpush3.bf16.msra.mxu0 %v778_v50 }
  0x6e   :  { %393 = vmatpush1.bf16.msra.mxu1 %v745_v24  ;;  %693 = vmatprep.subr.bf16.mxu0 %v779_v6 }
  0x6f   :  { %394 = vmatprep.subr.bf16.mxu1 %v746_v25 }
  0x71   :  { %694 = vmatpush3.bf16.msra.mxu0 %v780_v7 }
  0x72   :  { %395 = vmatpush1.bf16.msra.mxu1 %v748_v26  ;;  %695 = vmatprep.subr.bf16.mxu0 %v781_v8 }
  0x73   :  { %396 = vmatprep.subr.bf16.mxu1 %v749_v27  ;;  %v664_v27 = vld [vmem:[%s1036_s6] ss:$0 sm:$0xff]  ;;  %s875_s6 = scalar_lea.vmem %s617_s30, 128 }
  0x74   :  { %p876_p4 = scmp.ne.s32.totalorder %s617_s30, %s875_s6  ;;  %p881_p6 = scmp.lt.s32.totalorder %s875_s6, %s875_s6 }
  0x75   :  { %696 = vmatpush3.bf16.msra.mxu0 %v782_v9 }
  0x76   :  { %397 = vmatpush1.bf16.msra.mxu1 %v751_v28  ;;  %p882_p7 = por %p881_p6, %p880_p5 }
  0x77   :  { %398 = vmatprep.subr.bf16.mxu1 %v752_v29 }
  0x78   :  { %p883_p8 = pnand %p882_p7, %p876_p4 }
  0x7a   :  { %399 = vmatpush1.bf16.msra.mxu1 %v754_v30 }
  0x7b   :  { %400 = vmatprep.subr.bf16.mxu1 %v755_v31 }
  0x7e   :  { %401 = vmatpush1.bf16.msra.mxu1 %v757_v32 }
  0x7f   :  { %402 = vmatprep.subr.bf16.mxu1 %v758_v33 }
  0x82   :  { %403 = vmatpush1.bf16.msra.mxu1 %v760_v34 }
  0x83   :  { %404 = vmatprep.subr.bf16.mxu1 %v761_v35 }
  0x86   :  { %405 = vmatpush1.bf16.msra.mxu1 %v763_v36 }
  0x87   :  { %406 = vmatprep.subr.bf16.mxu1 %v764_v37 }
  0x8a   :  { %407 = vmatpush1.bf16.msra.mxu1 %v766_v38 }
 0x126   :  { %v157_v58 = vpop.f32.mrb[0].mxu0 }
 0x127   :  { %v158_v59 = vadd.f32 %v157_v58, %v92_v56  ;;  %v159_v60 = vpop.f32.mrb[1].mxu0 }
 0x128   :  { %v160_v61 = vadd.f32 %v159_v60, %v96_v57  ;;  %v161_v62 = vpop.f32.mrb[2].mxu0 }
 0x129   :  { %vm164_vm1 = vcmp.gt.f32.partialorder %v158_v59, 0.0  ;;  %v166_v63 = vmul.f32 0.01, %v158_v59  ;;  %v162_v0 = vpop.f32.mrb[3].mxu0 }
 0x12a   :  { %vm165_vm2 = vcmp.gt.f32.partialorder %v160_v61, 0.0  ;;  %v167_v1 = vmul.f32 0.01, %v160_v61 }
 0x12b   :  { %v168_v2 = vsel %vm164_vm1, %v158_v59, %v166_v63 }
 0x12c   :  { %v169_v3 = vsel %vm165_vm2, %v160_v61, %v167_v1  ;;  %v170_v5 = vpack.c.bf16 %v168_v2, %v168_v2 }
 0x12d   :  { %v171_v4 = vpack.c.bf16 %v169_v3, %v169_v3 }
 0x12f   :  { %408 = vmatprep.mubr.bf16.mxu1 %v171_v4 }
 0x130   :  { %409 = vmatmul.mubr.bf16.vlgmr.msra.gmra.mrb[0].mxu1 %v170_v5 }
 0x203   :  { %v410_v13 = vpop.f32.mrb[0].mxu1 }
 0x204   :  { %v411_v14 = vadd.f32 %v410_v13, %v209_v11  ;;  %v412_v15 = vpop.f32.mrb[1].mxu1 }
 0x205   :  { %v413_v16 = vadd.f32 %v412_v15, %v213_v12  ;;  %v414_v17 = vpop.f32.mrb[2].mxu1 }
 0x206   :  { %vm417_vm3 = vcmp.gt.f32.partialorder %v411_v14, 0.0  ;;  %v419_v18 = vmul.f32 0.01, %v411_v14  ;;  %v415_v19 = vpop.f32.mrb[3].mxu1 }
 0x207   :  { %vm418_vm4 = vcmp.gt.f32.partialorder %v413_v16, 0.0  ;;  %v420_v20 = vmul.f32 0.01, %v413_v16 }
 0x208   :  { %v421_v21 = vsel %vm417_vm3, %v411_v14, %v419_v18 }
 0x209   :  { %v422_v22 = vsel %vm418_vm4, %v413_v16, %v420_v20  ;;  %v423_v24 = vpack.c.bf16 %v421_v21, %v421_v21 }
 0x20a   :  { %v424_v23 = vpack.c.bf16 %v422_v22, %v422_v22 }
 0x20c   :  { %592 = vmatprep.mubr.bf16.mxu0 %v424_v23 }
 0x20d   :  { %593 = vmatmul.mubr.bf16.vlgmr.msra.gmra.mrb[4].mxu0 %v423_v24 }
 0x2e0   :  { %v697_v25 = vpop.f32.mrb[4].mxu0 }
 0x2e1   :  { %v698_v26 = vpop.f32.mrb[5].mxu0 }
 0x2e2   :  { %v699_v28 = vadd.f32 %v698_v26, %v697_v25  ;;  %v700_v29 = vpop.f32.mrb[6].mxu0 }
 0x2e3   :  { %v701_v30 = vpop.f32.mrb[7].mxu0 }
 0x2e4   :  { %v595_v31 = vadd.f32 %v699_v28, %v664_v27 }
 0x2e6   :  { %600 = vmax.xlane.f32.xlu0 %v595_v31 }
 0x373   :  { %v601_v32 = vpop.xlane.xlu0 %600 }
 0x374   :  { %v602_v33 = vsub.f32 %v595_v31, %v601_v32 }
 0x376   :  { %v603_v34 = vmul.f32 1.442695, %v602_v33 }
 0x378   :  { %783 = vpow2.f32 %v603_v34 }
 0x382   :  { %v784_v35 = vpop.eup %783 }
 0x383   :  { %605 = vadd.xlane.f32.xlu0 %v784_v35 }
 0x410   :  { %v606_v36 = vpop.xlane.xlu0 %605 }
 0x411   :  { %785 = vrcp.f32 %v606_v36 }
 0x41b   :  { %v786_v37 = vpop.eup %785 }
 0x41c   :  { %v608_v38 = vmul.f32 %v786_v37, %v784_v35 }
 0x41e   :  { %609 = vst [vmem:[#allocation10] sm:$0xff] %v608_v38 }
 0x41f   :  { %886 = shalt.err (!%p883_p8)
}
 0x420   :  { %s887_s10 = scalar_lea.hbm %s1037_s7, 128 }
 0x421   :  { %p888_p9 = scmp.ne.s32.totalorder %s1037_s7, %s887_s10  ;;  %p891_p10 = scmp.lt.u32.totalorder %s887_s10, %s1037_s7 }
 0x423   :  { %p893_p11 = pnand %p891_p10, %p888_p9 }
 0x425   :  { %896 = shalt.err (!%p893_p11)
}
 0x426   :  { %619 = dma.vmem_to_hbm [thread:$0]  %s617_s30, 128, %s1037_s7, [#allocation4]  }
 0x427   :  { %903 = dma.done.wait [#allocation4], 128  }
 0x428   :  { %904 = vsyncadd [#allocation4], 4294967168 }
 0x429   :  { %623 = vsyncpa [#allocation3], 1 }
 0x42a   :  { %624 = vsyncpa [#allocation6], 1 }
 0x42b   :  { %625 = vsyncpa [#allocation9], 1 }
 0x42c   :  { %626 = vsyncpa [#allocation4], 1 }

</bundles_post_ra>
